<compile_context>
chip_gen: v7x
topology: tpu7x:2x2x1
jax: 0.10.0
libtpu: 0.0.40
codegen_flags: <defaults>
</compile_context>

<pallas_src>
import functools

import jax
import jax.numpy as jnp
import numpy as np
from jax.experimental import pallas as pl
from jax.experimental.pallas import tpu as pltpu

SCENE_NUM = 4
LANE = 128


def _round_up(v, m):
    return ((v + m - 1) // m) * m


def _probe_kernel(tg_ref, tv_ref, x_ref, w_ref, b_ref, w1_ref, b1_ref, o_ref):
    """One row tile: y = relu(x @ Wt_scene + b_scene) @ W1t + b1."""
    del tg_ref  # scene id is only consumed by the index_maps
    i = pl.program_id(0)

    @pl.when(tv_ref[i] != 0)                  # skip tiles made entirely of padding rows
    def _():
        x = x_ref[...]                        # [tm, Dp]  bf16
        w = w_ref[0]                          # [Dp, Dp]  bf16 (this tile's scene)
        h = jnp.dot(x, w, preferred_element_type=jnp.float32) + b_ref[0]   # f32 acc
        h = jnp.maximum(h, 0.0).astype(jnp.bfloat16)                       # ReLU -> bf16
        out = jnp.dot(h, w1_ref[...], preferred_element_type=jnp.float32) + b1_ref[...]
        o_ref[...] = out.astype(o_ref.dtype)  # [tm, Hp] lane-dense store


def _probe_pallas(tile_group, tile_valid, x_padded, w_scenes_t, b_scenes, w1t, b1,
                  *, tm, single_buffer_shared):
    n_pad, d_pad = x_padded.shape
    h_pad = w1t.shape[1]
    num_tiles = n_pad // tm

    # Constant-index shared-linear blocks: single-buffer them (revisited, never
    # re-fetched) to halve their VMEM footprint.  Per-scene blocks keep default
    # double-buffering so the 3 group transitions stay overlapped.
    shared_kw = {"pipeline_mode": pl.Buffered(1)} if single_buffer_shared else {}

    flops = 2 * n_pad * d_pad * (d_pad + h_pad)
    bytes_accessed = (n_pad * d_pad * 2                      # x (bf16)
                      + SCENE_NUM * d_pad * d_pad * 2        # per-scene weights (bf16)
                      + SCENE_NUM * d_pad * 4                # per-scene biases (f32)
                      + d_pad * h_pad * 2 + h_pad * 4        # shared linear1
                      + n_pad * h_pad * 4)                   # output (f32)

    return pl.pallas_call(
        _probe_kernel,
        out_shape=jax.ShapeDtypeStruct((n_pad, h_pad), jnp.float32),
        grid_spec=pltpu.PrefetchScalarGridSpec(
            num_scalar_prefetch=2,             # tile_group, tile_valid live in SMEM
            grid=(num_tiles,),
            in_specs=[
                pl.BlockSpec((tm, d_pad), lambda i, tg, tv: (i, 0)),            # x tile
                pl.BlockSpec((1, d_pad, d_pad), lambda i, tg, tv: (tg[i], 0, 0)),  # scene Wt
                pl.BlockSpec((1, 1, d_pad), lambda i, tg, tv: (tg[i], 0, 0)),      # scene b
                pl.BlockSpec((d_pad, h_pad), lambda i, tg, tv: (0, 0), **shared_kw),  # W1t
                pl.BlockSpec((1, h_pad), lambda i, tg, tv: (0, 0), **shared_kw),      # b1
            ],
            out_specs=pl.BlockSpec((tm, h_pad), lambda i, tg, tv: (i, 0)),
        ),
        compiler_params=pltpu.CompilerParams(
            dimension_semantics=("parallel",)),   # row tiles independent -> megacore
        cost_estimate=pl.CostEstimate(flops=flops, transcendentals=0,
                                      bytes_accessed=bytes_accessed),
    )(tile_group, tile_valid, x_padded, w_scenes_t, b_scenes, w1t, b1)


@functools.partial(jax.jit, static_argnames=("tm", "single_buffer_shared"))
def linear_probe_per_scene(x, scene_sign, params, *, tm=None, single_buffer_shared=True):
    """Exact forward of LinearProbe_PerScene.

    x: [N, D] float32, scene_sign: [N] int32 with values in {1,2,3,4}.
    Returns [N, H] float32 with rows grouped by scene (1 first, then 2, 3, 4),
    matching torch.cat((x[s==1], x[s==2], x[s==3], x[s==4]), 0) semantics.
    """
    n, d = x.shape
    h_dim = params["w1_t"].shape[1]

    if tm is None:
        tm = 256 if n >= 2048 else 128     # 256-row tiles feed v6e/v7x MXU; 128 for small N

    d_pad = _round_up(d, LANE)             # lane-dense K for both matmuls
    h_pad = _round_up(h_dim, LANE)         # lane-dense output store

    # ---- regroup rows by scene: pure-int glue, no argsort / no x_sorted gather ----
    g = jnp.clip(scene_sign.astype(jnp.int32) - 1, 0, SCENE_NUM - 1)
    onehot = g[:, None] == jnp.arange(SCENE_NUM, dtype=jnp.int32)[None, :]
    counts = jnp.sum(onehot, axis=0).astype(jnp.int32)                      # rows per scene
    rank = (jnp.cumsum(onehot, axis=0)[jnp.arange(n), g] - 1).astype(jnp.int32)

    group_starts = jnp.concatenate(
        [jnp.zeros((1,), jnp.int32), jnp.cumsum(counts)[:-1].astype(jnp.int32)])
    pad_counts = ((counts + tm - 1) // tm) * tm        # each scene padded to the row tile
    cum_pad = jnp.cumsum(pad_counts).astype(jnp.int32)
    pad_offsets = jnp.concatenate([jnp.zeros((1,), jnp.int32), cum_pad[:-1]])

    num_tiles = max((n + SCENE_NUM * (tm - 1)) // tm, 1)   # tight static worst case
    n_pad = num_tiles * tm

    dest = pad_offsets[g] + rank            # slot of original row i in the padded buffer
    sortpos = group_starts[g] + rank        # its position in torch.cat order
    dest_sorted = jnp.zeros((n,), jnp.int32).at[sortpos].set(dest)

    # Scatter rows straight into the scene-padded, lane-padded bf16 buffer
    # (single write pass; column padding is implicit zeros).
    x_padded = jnp.zeros((n_pad, d_pad), jnp.bfloat16).at[dest, :d].set(
        x.astype(jnp.bfloat16))

    # Per-tile scene id + validity flag for scalar prefetch.
    tile_start = jnp.arange(num_tiles, dtype=jnp.int32) * tm
    tile_group = jnp.minimum(
        jnp.sum(tile_start[:, None] >= cum_pad[None, :], axis=1), SCENE_NUM - 1
    ).astype(jnp.int32)
    tile_valid = ((tile_start - pad_offsets[tile_group]) < counts[tile_group]
                  ).astype(jnp.int32)

    # ---- pack parameters: bf16 matmul operands, f32 biases, lane-dense shapes ----
    # (pre-pack once outside jit in a real deployment; cheap one-time cost here)
    w_scenes = jnp.pad(params["w_scenes_t"],
                       ((0, 0), (0, d_pad - d), (0, d_pad - d))).astype(jnp.bfloat16)
    b_scenes = jnp.pad(params["b_scenes"], ((0, 0), (0, d_pad - d))
                       ).reshape(SCENE_NUM, 1, d_pad).astype(jnp.float32)
    w1t = jnp.pad(params["w1_t"],
                  ((0, d_pad - d), (0, h_pad - h_dim))).astype(jnp.bfloat16)
    b1 = jnp.pad(params["b1"], (0, h_pad - h_dim)).reshape(1, h_pad).astype(jnp.float32)

    out_padded = _probe_pallas(tile_group, tile_valid, x_padded, w_scenes, b_scenes,
                               w1t, b1, tm=tm, single_buffer_shared=single_buffer_shared)

    # Real rows back in torch.cat order; drop H padding.  Padded rows / invalid
    # tiles are never referenced by dest_sorted.
    return out_padded[dest_sorted, :h_dim]


def init_params(key, input_size, hidden_size):
    """Deterministic nn.Linear-style init (uniform +/- 1/sqrt(fan_in)).

    Per-scene weights are stored TRANSPOSED as [scene, D_in, D_out]; linear1 as
    [D_in, H] so the kernel computes y = x @ Wt + b (matches y = x @ W.T + b).
    """
    ks = jax.random.split(key, 4)
    bound = 1.0 / np.sqrt(input_size)
    w_scenes = jax.random.uniform(ks[0], (SCENE_NUM, input_size, input_size),
                                  jnp.float32, -bound, bound)
    b_scenes = jax.random.uniform(ks[1], (SCENE_NUM, input_size),
                                  jnp.float32, -bound, bound)
    w1_t = jax.random.uniform(ks[2], (input_size, hidden_size),
                              jnp.float32, -bound, bound)
    b1 = jax.random.uniform(ks[3], (hidden_size,), jnp.float32, -bound, bound)
    return {"w_scenes_t": w_scenes, "b_scenes": b_scenes, "w1_t": w1_t, "b1": b1}


def reference_forward_f32(x, scene_sign, params):
    """Pure-JAX f32 reference mirroring the PyTorch module line by line."""
    parts = []
    for i in range(SCENE_NUM):
        xi = x[scene_sign == (i + 1)]
        parts.append(xi @ params["w_scenes_t"][i] + params["b_scenes"][i])
    h = jnp.maximum(jnp.concatenate(parts, axis=0), 0.0)
    return h @ params["w1_t"] + params["b1"]


def reference_forward_bf16(x, scene_sign, params):
    """Same math, mirroring the kernel's bf16-operand / f32-accumulate strategy."""
    xb = x.astype(jnp.bfloat16)
    parts = []
    for i in range(SCENE_NUM):
        xi = xb[scene_sign == (i + 1)]
        wi = params["w_scenes_t"][i].astype(jnp.bfloat16)
        parts.append(jnp.dot(xi, wi, preferred_element_type=jnp.float32)
                     + params["b_scenes"][i])
    h = jnp.maximum(jnp.concatenate(parts, axis=0), 0.0).astype(jnp.bfloat16)
    return (jnp.dot(h, params["w1_t"].astype(jnp.bfloat16),
                    preferred_element_type=jnp.float32) + params["b1"])


if __name__ == "__main__":
    N, D, H = 24, 32, 16           # batch, input_size, hidden_size
    key = jax.random.PRNGKey(0)
    kx, ks, kp = jax.random.split(key, 3)

    x = jax.random.normal(kx, (N, D), jnp.float32)
    scene_sign = jax.random.randint(ks, (N,), 1, SCENE_NUM + 1, dtype=jnp.int32)
    params = init_params(kp, D, H)

    try:
        out = jax.block_until_ready(linear_probe_per_scene(x, scene_sign, params))
    except Exception:
        # Fallback if pipeline_mode=pl.Buffered(1) is rejected by this jax/libtpu:
        # retrace with default double-buffering (identical semantics).
        out = jax.block_until_ready(
            linear_probe_per_scene(x, scene_sign, params, single_buffer_shared=False))

    # Tight check vs a dtype-matched (bf16 operands, f32 accumulate) reference.
    ref16 = reference_forward_bf16(x, scene_sign, params)
    np.testing.assert_allclose(np.asarray(out), np.asarray(ref16), rtol=2e-3, atol=2e-3)

    # Loose check vs the exact f32 PyTorch-equivalent reference (bf16 MXU drift).
    ref32 = reference_forward_f32(x, scene_sign, params)
    np.testing.assert_allclose(np.asarray(out), np.asarray(ref32), rtol=1e-1, atol=1e-1)

    print("KERNEL_OK")
</pallas_src>

<mosaic_0001>
module attributes {stable_mosaic.version = 11 : i64} {
  func.func @_probe_kernel(%arg0: i32, %arg1: memref<4xi32, #tpu.memory_space<smem>>, %arg2: memref<4xi32, #tpu.memory_space<smem>>, %arg3: memref<128x128xbf16, #tpu.memory_space<vmem>>, %arg4: memref<1x128x128xbf16, #tpu.memory_space<vmem>>, %arg5: memref<1x1x128xf32, #tpu.memory_space<vmem>>, %arg6: memref<128x128xbf16, #tpu.memory_space<vmem>>, %arg7: memref<1x128xf32, #tpu.memory_space<vmem>>, %arg8: memref<128x128xf32, #tpu.memory_space<vmem>>) attributes {dimension_semantics = [#tpu.dimension_semantics<parallel>], iteration_bounds = array<i64: 4>, scalar_prefetch = 2 : i64, scratch_operands = 0 : i64, tpu.core_type = #tpu.core_type<tc>, window_params = [{transform_indices = @transform_0, window_bounds = array<i64: 128, 128>}, {transform_indices = @transform_1, window_bounds = array<i64: 1, 128, 128>}, {transform_indices = @transform_2, window_bounds = array<i64: 1, 1, 128>}, {pipeline_mode = #tpu.pipeline_mode<synchronous>, transform_indices = @transform_3, window_bounds = array<i64: 128, 128>}, {pipeline_mode = #tpu.pipeline_mode<synchronous>, transform_indices = @transform_4, window_bounds = array<i64: 1, 128>}, {transform_indices = @transform_5, window_bounds = array<i64: 128, 128>}]} {
    %0 = arith.index_cast %arg0 : i32 to index
    %1 = memref.load %arg2[%0] : memref<4xi32, #tpu.memory_space<smem>>
    %c0_i32 = arith.constant 0 : i32
    %2 = arith.cmpi ne, %1, %c0_i32 : i32
    %3 = arith.extui %2 : i1 to i32
    %c0_i32_0 = arith.constant 0 : i32
    %4 = arith.cmpi ne, %3, %c0_i32_0 : i32
    scf.if %4 {
      %c0 = arith.constant 0 : index
      %c0_1 = arith.constant 0 : index
      %5 = vector.load %arg3[%c0, %c0_1] : memref<128x128xbf16, #tpu.memory_space<vmem>>, vector<128x128xbf16>
      %c0_2 = arith.constant 0 : index
      %c0_3 = arith.constant 0 : index
      %c0_4 = arith.constant 0 : index
      %6 = vector.load %arg4[%c0_2, %c0_3, %c0_4] : memref<1x128x128xbf16, #tpu.memory_space<vmem>>, vector<1x128x128xbf16>
      %7 = vector.shape_cast %6 : vector<1x128x128xbf16> to vector<128x128xbf16>
      %cst = arith.constant dense<0.000000e+00> : vector<128x128xf32>
      %8 = tpu.matmul %5, %7, %cst {dimension_numbers = #tpu.dot_dimension_numbers<[1], [0], [0], [1], [0, 0, 1, 1], [], []>} : vector<128x128xbf16>, vector<128x128xbf16>, vector<128x128xf32> -> vector<128x128xf32>
      %c0_5 = arith.constant 0 : index
      %c0_6 = arith.constant 0 : index
      %c0_7 = arith.constant 0 : index
      %9 = vector.load %arg5[%c0_5, %c0_6, %c0_7] : memref<1x1x128xf32, #tpu.memory_space<vmem>>, vector<1x1x128xf32>
      %10 = vector.shape_cast %9 : vector<1x1x128xf32> to vector<1x128xf32>
      %11 = vector.broadcast %10 : vector<1x128xf32> to vector<128x128xf32>
      %12 = arith.addf %8, %11 : vector<128x128xf32>
      %cst_8 = arith.constant 0.000000e+00 : f32
      %13 = vector.broadcast %cst_8 : f32 to vector<128x128xf32>
      %14 = arith.maximumf %12, %13 : vector<128x128xf32>
      %15 = arith.truncf %14 : vector<128x128xf32> to vector<128x128xbf16>
      %c0_9 = arith.constant 0 : index
      %c0_10 = arith.constant 0 : index
      %16 = vector.load %arg6[%c0_9, %c0_10] : memref<128x128xbf16, #tpu.memory_space<vmem>>, vector<128x128xbf16>
      %cst_11 = arith.constant dense<0.000000e+00> : vector<128x128xf32>
      %17 = tpu.matmul %15, %16, %cst_11 {dimension_numbers = #tpu.dot_dimension_numbers<[1], [0], [0], [1], [0, 0, 1, 1], [], []>} : vector<128x128xbf16>, vector<128x128xbf16>, vector<128x128xf32> -> vector<128x128xf32>
      %c0_12 = arith.constant 0 : index
      %c0_13 = arith.constant 0 : index
      %18 = vector.load %arg7[%c0_12, %c0_13] : memref<1x128xf32, #tpu.memory_space<vmem>>, vector<1x128xf32>
      %19 = vector.broadcast %18 : vector<1x128xf32> to vector<128x128xf32>
      %20 = arith.addf %17, %19 : vector<128x128xf32>
      %c0_14 = arith.constant 0 : index
      %c0_15 = arith.constant 0 : index
      %21 = vector.load %arg8[%c0_14, %c0_15] : memref<128x128xf32, #tpu.memory_space<vmem>>, vector<128x128xf32>
      tpu.vector_store %arg8[%c0_14, %c0_15], %20 {strides = array<i32>} : memref<128x128xf32, #tpu.memory_space<vmem>>, vector<128x128xf32>,
    } else {
    }
    return
  }
  func.func @transform_0(%arg0: i32, %arg1: memref<4xi32, #tpu.memory_space<smem>>, %arg2: memref<4xi32, #tpu.memory_space<smem>>) -> (i32, i32) {
    %c0_i32 = arith.constant 0 : i32
    %c0_i32_0 = arith.constant 0 : i32
    return %arg0, %c0_i32 : i32, i32
  }
  func.func @transform_1(%arg0: i32, %arg1: memref<4xi32, #tpu.memory_space<smem>>, %arg2: memref<4xi32, #tpu.memory_space<smem>>) -> (i32, i32, i32) {
    %0 = arith.index_cast %arg0 : i32 to index
    %1 = memref.load %arg1[%0] : memref<4xi32, #tpu.memory_space<smem>>
    %c0_i32 = arith.constant 0 : i32
    %c0_i32_0 = arith.constant 0 : i32
    %c0_i32_1 = arith.constant 0 : i32
    return %1, %c0_i32, %c0_i32_0 : i32, i32, i32
  }
  func.func @transform_2(%arg0: i32, %arg1: memref<4xi32, #tpu.memory_space<smem>>, %arg2: memref<4xi32, #tpu.memory_space<smem>>) -> (i32, i32, i32) {
    %0 = arith.index_cast %arg0 : i32 to index
    %1 = memref.load %arg1[%0] : memref<4xi32, #tpu.memory_space<smem>>
    %c0_i32 = arith.constant 0 : i32
    %c0_i32_0 = arith.constant 0 : i32
    %c0_i32_1 = arith.constant 0 : i32
    return %1, %c0_i32, %c0_i32_0 : i32, i32, i32
  }
  func.func @transform_3(%arg0: i32, %arg1: memref<4xi32, #tpu.memory_space<smem>>, %arg2: memref<4xi32, #tpu.memory_space<smem>>) -> (i32, i32) {
    %c0_i32 = arith.constant 0 : i32
    %c0_i32_0 = arith.constant 0 : i32
    %c0_i32_1 = arith.constant 0 : i32
    return %c0_i32, %c0_i32_0 : i32, i32
  }
  func.func @transform_4(%arg0: i32, %arg1: memref<4xi32, #tpu.memory_space<smem>>, %arg2: memref<4xi32, #tpu.memory_space<smem>>) -> (i32, i32) {
    %c0_i32 = arith.constant 0 : i32
    %c0_i32_0 = arith.constant 0 : i32
    %c0_i32_1 = arith.constant 0 : i32
    return %c0_i32, %c0_i32_0 : i32, i32
  }
  func.func @transform_5(%arg0: i32, %arg1: memref<4xi32, #tpu.memory_space<smem>>, %arg2: memref<4xi32, #tpu.memory_space<smem>>) -> (i32, i32) {
    %c0_i32 = arith.constant 0 : i32
    %c0_i32_0 = arith.constant 0 : i32
    return %arg0, %c0_i32 : i32, i32
  }
}

module attributes {stable_mosaic.version = 11 : i64} {
  func.func @_probe_kernel(%arg0: i32, %arg1: memref<4xi32, #tpu.memory_space<smem>>, %arg2: memref<4xi32, #tpu.memory_space<smem>>, %arg3: memref<128x128xbf16, #tpu.memory_space<vmem>>, %arg4: memref<1x128x128xbf16, #tpu.memory_space<vmem>>, %arg5: memref<1x1x128xf32, #tpu.memory_space<vmem>>, %arg6: memref<128x128xbf16, #tpu.memory_space<vmem>>, %arg7: memref<1x128xf32, #tpu.memory_space<vmem>>, %arg8: memref<128x128xf32, #tpu.memory_space<vmem>>) attributes {dimension_semantics = [#tpu.dimension_semantics<parallel>], iteration_bounds = array<i64: 4>, scalar_prefetch = 2 : i64, scratch_operands = 0 : i64, tpu.core_type = #tpu.core_type<tc>, window_params = [{transform_indices = @transform_0, window_bounds = array<i64: 128, 128>}, {transform_indices = @transform_1, window_bounds = array<i64: 1, 128, 128>}, {transform_indices = @transform_2, window_bounds = array<i64: 1, 1, 128>}, {pipeline_mode = #tpu.pipeline_mode<synchronous>, transform_indices = @transform_3, window_bounds = array<i64: 128, 128>}, {pipeline_mode = #tpu.pipeline_mode<synchronous>, transform_indices = @transform_4, window_bounds = array<i64: 1, 128>}, {transform_indices = @transform_5, window_bounds = array<i64: 128, 128>}]} {
    %0 = arith.index_cast %arg0 : i32 to index
    %1 = memref.load %arg2[%0] : memref<4xi32, #tpu.memory_space<smem>>
    %c0_i32 = arith.constant 0 : i32
    %2 = arith.cmpi ne, %1, %c0_i32 : i32
    %3 = arith.extui %2 : i1 to i32
    %c0_i32_0 = arith.constant 0 : i32
    %4 = arith.cmpi ne, %3, %c0_i32_0 : i32
    scf.if %4 {
      %c0 = arith.constant 0 : index
      %c0_1 = arith.constant 0 : index
      %5 = vector.load %arg3[%c0, %c0_1] : memref<128x128xbf16, #tpu.memory_space<vmem>>, vector<128x128xbf16>
      %c0_2 = arith.constant 0 : index
      %c0_3 = arith.constant 0 : index
      %c0_4 = arith.constant 0 : index
      %6 = vector.load %arg4[%c0_2, %c0_3, %c0_4] : memref<1x128x128xbf16, #tpu.memory_space<vmem>>, vector<1x128x128xbf16>
      %7 = vector.shape_cast %6 : vector<1x128x128xbf16> to vector<128x128xbf16>
      %cst = arith.constant dense<0.000000e+00> : vector<128x128xf32>
      %8 = tpu.matmul %5, %7, %cst {dimension_numbers = #tpu.dot_dimension_numbers<[1], [0], [0], [1], [0, 0, 1, 1], [], []>} : vector<128x128xbf16>, vector<128x128xbf16>, vector<128x128xf32> -> vector<128x128xf32>
      %c0_5 = arith.constant 0 : index
      %c0_6 = arith.constant 0 : index
      %c0_7 = arith.constant 0 : index
      %9 = vector.load %arg5[%c0_5, %c0_6, %c0_7] : memref<1x1x128xf32, #tpu.memory_space<vmem>>, vector<1x1x128xf32>
      %10 = vector.shape_cast %9 : vector<1x1x128xf32> to vector<1x128xf32>
      %11 = vector.broadcast %10 : vector<1x128xf32> to vector<128x128xf32>
      %12 = arith.addf %8, %11 : vector<128x128xf32>
      %cst_8 = arith.constant 0.000000e+00 : f32
      %13 = vector.broadcast %cst_8 : f32 to vector<128x128xf32>
      %14 = arith.maximumf %12, %13 : vector<128x128xf32>
      %15 = arith.truncf %14 : vector<128x128xf32> to vector<128x128xbf16>
      %c0_9 = arith.constant 0 : index
      %c0_10 = arith.constant 0 : index
      %16 = vector.load %arg6[%c0_9, %c0_10] : memref<128x128xbf16, #tpu.memory_space<vmem>>, vector<128x128xbf16>
      %cst_11 = arith.constant dense<0.000000e+00> : vector<128x128xf32>
      %17 = tpu.matmul %15, %16, %cst_11 {dimension_numbers = #tpu.dot_dimension_numbers<[1], [0], [0], [1], [0, 0, 1, 1], [], []>} : vector<128x128xbf16>, vector<128x128xbf16>, vector<128x128xf32> -> vector<128x128xf32>
      %c0_12 = arith.constant 0 : index
      %c0_13 = arith.constant 0 : index
      %18 = vector.load %arg7[%c0_12, %c0_13] : memref<1x128xf32, #tpu.memory_space<vmem>>, vector<1x128xf32>
      %19 = vector.broadcast %18 : vector<1x128xf32> to vector<128x128xf32>
      %20 = arith.addf %17, %19 : vector<128x128xf32>
      %c0_14 = arith.constant 0 : index
      %c0_15 = arith.constant 0 : index
      %21 = vector.load %arg8[%c0_14, %c0_15] : memref<128x128xf32, #tpu.memory_space<vmem>>, vector<128x128xf32>
      tpu.vector_store %arg8[%c0_14, %c0_15], %20 {strides = array<i32>} : memref<128x128xf32, #tpu.memory_space<vmem>>, vector<128x128xf32>,
    } else {
    }
    return
  }
  func.func @transform_0(%arg0: i32, %arg1: memref<4xi32, #tpu.memory_space<smem>>, %arg2: memref<4xi32, #tpu.memory_space<smem>>) -> (i32, i32) {
    %c0_i32 = arith.constant 0 : i32
    %c0_i32_0 = arith.constant 0 : i32
    return %arg0, %c0_i32 : i32, i32
  }
  func.func @transform_1(%arg0: i32, %arg1: memref<4xi32, #tpu.memory_space<smem>>, %arg2: memref<4xi32, #tpu.memory_space<smem>>) -> (i32, i32, i32) {
    %0 = arith.index_cast %arg0 : i32 to index
    %1 = memref.load %arg1[%0] : memref<4xi32, #tpu.memory_space<smem>>
    %c0_i32 = arith.constant 0 : i32
    %c0_i32_0 = arith.constant 0 : i32
    %c0_i32_1 = arith.constant 0 : i32
    return %1, %c0_i32, %c0_i32_0 : i32, i32, i32
  }
  func.func @transform_2(%arg0: i32, %arg1: memref<4xi32, #tpu.memory_space<smem>>, %arg2: memref<4xi32, #tpu.memory_space<smem>>) -> (i32, i32, i32) {
    %0 = arith.index_cast %arg0 : i32 to index
    %1 = memref.load %arg1[%0] : memref<4xi32, #tpu.memory_space<smem>>
    %c0_i32 = arith.constant 0 : i32
    %c0_i32_0 = arith.constant 0 : i32
    %c0_i32_1 = arith.constant 0 : i32
    return %1, %c0_i32, %c0_i32_0 : i32, i32, i32
  }
  func.func @transform_3(%arg0: i32, %arg1: memref<4xi32, #tpu.memory_space<smem>>, %arg2: memref<4xi32, #tpu.memory_space<smem>>) -> (i32, i32) {
    %c0_i32 = arith.constant 0 : i32
    %c0_i32_0 = arith.constant 0 : i32
    %c0_i32_1 = arith.constant 0 : i32
    return %c0_i32, %c0_i32_0 : i32, i32
  }
  func.func @transform_4(%arg0: i32, %arg1: memref<4xi32, #tpu.memory_space<smem>>, %arg2: memref<4xi32, #tpu.memory_space<smem>>) -> (i32, i32) {
    %c0_i32 = arith.constant 0 : i32
    %c0_i32_0 = arith.constant 0 : i32
    %c0_i32_1 = arith.constant 0 : i32
    return %c0_i32, %c0_i32_0 : i32, i32
  }
  func.func @transform_5(%arg0: i32, %arg1: memref<4xi32, #tpu.memory_space<smem>>, %arg2: memref<4xi32, #tpu.memory_space<smem>>) -> (i32, i32) {
    %c0_i32 = arith.constant 0 : i32
    %c0_i32_0 = arith.constant 0 : i32
    return %arg0, %c0_i32 : i32, i32
  }
}

</mosaic_0001>

<bundles_post_ra>
// kernel: custom-call.6
= control target key start
LH: loop header
LB: loop body
LE: loop exit
PB: predicated region body
PF: predicated region fallthrough
CT: control target
= control target key end

     0   :  { %s6_s0 = inlined_call_operand.vmem [shape: f32[24,16], index: 0, kind: output, shape index: {}]  }

// kernel: linear_probe_per_scene.1
= control target key start
LH: loop header
LB: loop body
LE: loop exit
PB: predicated region body
PF: predicated region fallthrough
CT: control target
= control target key end

     0   :  { %s1160_s0 = inlined_call_operand.vmem [shape: s32[4], index: 0, kind: input, shape index: {}]   ;;  %s1161_s2 = inlined_call_operand.vmem [shape: bf16[512,128], index: 2, kind: input, shape index: {}]   ;;  %s1162_s3 = inlined_call_operand.vmem [shape: bf16[4,128,128], index: 3, kind: input, shape index: {}]   ;;  %s1163_s4 = inlined_call_operand.vmem [shape: f32[4,1,128], index: 4, kind: input, shape index: {}]   ;;  %s1164_s5 = inlined_call_operand.vmem [shape: bf16[128,128], index: 5, kind: input, shape index: {}]   ;;  %s1165_s6 = inlined_call_operand.vmem [shape: f32[1,128], index: 6, kind: input, shape index: {}]   ;;  %s1166_s7 = inlined_call_operand.vmem [shape: f32[512,128], index: 7, kind: output, shape index: {}]   ;;  %s1167_s1 = inlined_call_operand.vmem [shape: s32[4], index: 1, kind: input, shape index: {}]  }
   0x1   :  { %s12_s26 = sshll.u32 %s1160_s0, 4  ;;  %s16_s29 = sshll.u32 %s1167_s1, 4  ;;  %s13_s26 = int_to_ptr.vmem [resolvable:$true] %s12_s26  ;;  %s17_s29 = int_to_ptr.vmem [resolvable:$true] %s16_s29 }
   0x2   :  { %s982_s30 = scalar_lea.vmem %s13_s26, 16  ;;  %p987_p1 = scmp.lt.s32.totalorder %s13_s26, %s13_s26 }
   0x3   :  { %p983_p0 = scmp.ne.s32.totalorder %s13_s26, %s982_s30  ;;  %p988_p2 = scmp.lt.s32.totalorder %s982_s30, %s982_s30 }
   0x5   :  { %p989_p3 = por %p988_p2, %p987_p1 }
   0x7   :  { %p990_p4 = pnand %p989_p3, %p983_p0 }
   0x9   :  { %993 = shalt.err (!%p990_p4)  }
   0xa   :  { %s1016_s8 = smov [#allocation3]   ;;  %s994_s9 = scalar_lea.vmem %s17_s29, 16 }
   0xb   :  { %15 = dma.vmem_to_smem %s13_s26, 16, %s1016_s8, [#allocation2] }
   0xc   :  { %p995_p5 = scmp.ne.s32.totalorder %s17_s29, %s994_s9  ;;  %p999_p6 = scmp.lt.s32.totalorder %s17_s29, %s17_s29 }
   0xd   :  { %p1000_p7 = scmp.lt.s32.totalorder %s994_s9, %s994_s9 }
   0xf   :  { %p1001_p8 = por %p1000_p7, %p999_p6 }
  0x11   :  { %p1002_p9 = pnand %p1001_p8, %p995_p5 }
  0x13   :  { %1005 = shalt.err (!%p1002_p9)  }
  0x14   :  { %s1017_s0 = smov [#allocation4]  }
  0x15   :  { %19 = dma.vmem_to_smem %s17_s29, 16, %s1017_s0, [#allocation2] }
  0x16   :  { %1010 = dma.done.wait [#allocation2], 32 }
  0x17   :  { %1011 = vsyncadd [#allocation2], 4294967264 }
  0x18   :  { %21 = sfence }
  0x19   :  { %s1064_s1 = smov 0  }
  0x1a LB: > { %s811_s10 = sadd.s32 4294967295, %s1014_s1   ;;  %p815_p10 = scmp.ge.s32.totalorder %s1014_s1, 1  ;;  %s1014_s1 = sphi %s1064_s1, %s27_s1  }
  0x1b   : > { %p226_p11 = scmp.lt.s32.totalorder %s1014_s1, 5 }
  0x1d   : > { %p227_p12 = pnand %p815_p10, %p226_p11 }
  0x1e   : > { %s816_s11 = sshll.u32 (!%p227_p12), %s811_s10, 4  ;;  %s270_s12 = sld [smem:[#allocation3 + %s811_s10]] (!%p227_p12) }
  0x1f   : > { %230 = sbr.rel (%p227_p12) target bundleno = 541 (0x21d), region = 40  ;;  %p265_p13 = scmp.lt.s32.totalorder (!%p227_p12), %s816_s11, 63 }
  0x20   : > { %s277_s13 = sld [smem:[#allocation3 + %s811_s10]] (!%p227_p12) }
  0x21   : > { %s289_s14 = sld [smem:[#allocation4 + %s811_s10]] (!%p227_p12) }
  0x24   : > { %p271_p0 = scmp.lt.s32.totalorder (!%p227_p12), %s270_s12, 3 }
  0x26   : > { %s1169_s11 = smov (!%p265_p13, %s816_s11), 63  ;;  %p278_p1 = scmp.lt.s32.totalorder %s277_s13, 3 }
  0x27   : > { %s817_s15 = sshll.u32 %s1169_s11, 2  ;;  %s821_s16 = sshll.u32 %s1169_s11, 3 }
  0x28   : > { %s1075_s19 = scalar_lea.vmem %s1161_s2, %s817_s15  ;;  %s1080_s22 = scalar_lea.vmem %s1166_s7, %s821_s16 }
  0x29   : > { %s1171_s12 = smov (!%p271_p0, %s270_s12), 3  ;;  %s1173_s13 = smov (!%p278_p1, %s277_s13), 3 }
  0x2a   : > { %s851_s23 = sshll.u32 %s1171_s12, 6  ;;  %s280_s29 = scalar_lea.vmem %s1163_s4, %s1173_s13 }
  0x2b   : > { %s1087_s26 = scalar_lea.vmem %s1162_s3, %s851_s23  ;;  %p822_p2 = scmp.eq.s32.totalorder %s289_s14, 0 }
  0x2c   : > { %v958_v0 = vld [vmem:[%s1087_s26] sm:$0xff] (!%p822_p2)   ;;  %v959_v1 = vld [vmem:[%s1087_s26 + $0x8] sm:$0xff] (!%p822_p2)   ;;  %v960_v2 = vld [vmem:[%s1087_s26 + $0x10] sm:$0xff] (!%p822_p2)  }
  0x2d   : > { %293 = sbr.rel (%p822_p2) target bundleno = 541 (0x21d), region = 44  ;;  %884 = vmatprep.subr.bf16.mxu0 (!%p822_p2), %v958_v0  ;;  %v961_v3 = vld [vmem:[%s1087_s26 + $0x18] sm:$0xff] (!%p822_p2)   ;;  %v966_v4 = vld [vmem:[%s1075_s19] sm:$0xff] (!%p822_p2)   ;;  %v963_v6 = vld [vmem:[%s1087_s26 + $0x28] sm:$0xff] (!%p822_p2)  }
  0x2e   : > { %885 = vmatpush3.bf16.msra.mxu0 (!%p822_p2), %v958_v0  ;;  %900 = vmatprep.mubr.bf16.mxu0 (!%p822_p2), %v966_v4  ;;  %v962_v5 = vld [vmem:[%s1087_s26 + $0x20] sm:$0xff] (!%p822_p2)   ;;  %v975_v8 = vld [vmem:[%s1164_s5 + $0x8] sm:$0xff] (!%p822_p2)   ;;  %v964_v9 = vld [vmem:[%s1087_s26 + $0x30] sm:$0xff] (!%p822_p2)  }
  0x2f   : > { %886 = vmatprep.subr.bf16.mxu0 (!%p822_p2), %v959_v1  ;;  %v974_v7 = vld [vmem:[%s1164_s5] sm:$0xff] (!%p822_p2)   ;;  %v976_v10 = vld [vmem:[%s1164_s5 + $0x10] sm:$0xff] (!%p822_p2)   ;;  %v965_v11 = vld [vmem:[%s1087_s26 + $0x38] sm:$0xff] (!%p822_p2)  }
  0x30   : > { %916 = vmatprep.subr.bf16.mxu1 (!%p822_p2), %v974_v7  ;;  %v977_v12 = vld [vmem:[%s1164_s5 + $0x18] sm:$0xff] (!%p822_p2)   ;;  %v978_v13 = vld [vmem:[%s1164_s5 + $0x20] sm:$0xff] (!%p822_p2)   ;;  %v967_v14 = vld [vmem:[%s1075_s19 + $0x8] sm:$0xff] (!%p822_p2)  }
  0x31   : > { %917 = vmatpush3.bf16.msra.mxu1 (!%p822_p2), %v974_v7  ;;  %v968_v15 = vld [vmem:[%s1075_s19 + $0x10] sm:$0xff] (!%p822_p2)   ;;  %v979_v16 = vld [vmem:[%s1164_s5 + $0x28] sm:$0xff] (!%p822_p2)   ;;  %v969_v17 = vld [vmem:[%s1075_s19 + $0x18] sm:$0xff] (!%p822_p2)  }
  0x32   : > { %887 = vmatpush3.bf16.msra.mxu0 (!%p822_p2), %v959_v1  ;;  %918 = vmatprep.subr.bf16.mxu1 (!%p822_p2), %v975_v8  ;;  %v970_v18 = vld [vmem:[%s1075_s19 + $0x20] sm:$0xff] (!%p822_p2)   ;;  %v971_v19 = vld [vmem:[%s1075_s19 + $0x28] sm:$0xff] (!%p822_p2)   ;;  %v972_v20 = vld [vmem:[%s1075_s19 + $0x30] sm:$0xff] (!%p822_p2)  }
  0x33   : > { %888 = vmatprep.subr.bf16.mxu0 (!%p822_p2), %v960_v2  ;;  %v973_v21 = vld [vmem:[%s1075_s19 + $0x38] sm:$0xff] (!%p822_p2)   ;;  %v980_v22 = vld [vmem:[%s1164_s5 + $0x30] sm:$0xff] (!%p822_p2)   ;;  %v823_v24 = vld [vmem:[%s280_s29] ss:$0 sm:$0xff] (!%p822_p2) }
  0x34   : > { %v981_v23 = vld [vmem:[%s1164_s5 + $0x38] sm:$0xff]  }
  0x35   : > { %919 = vmatpush3.bf16.msra.mxu1 %v975_v8 }
  0x36   : > { %889 = vmatpush3.bf16.msra.mxu0 %v960_v2  ;;  %920 = vmatprep.subr.bf16.mxu1 %v976_v10 }
  0x37   : > { %890 = vmatprep.subr.bf16.mxu0 %v961_v3 }
  0x39   : > { %921 = vmatpush3.bf16.msra.mxu1 %v976_v10 }
  0x3a   : > { %891 = vmatpush3.bf16.msra.mxu0 %v961_v3  ;;  %922 = vmatprep.subr.bf16.mxu1 %v977_v12 }
  0x3b   : > { %892 = vmatprep.subr.bf16.mxu0 %v962_v5 }
  0x3d   : > { %923 = vmatpush3.bf16.msra.mxu1 %v977_v12 }
  0x3e   : > { %893 = vmatpush3.bf16.msra.mxu0 %v962_v5  ;;  %924 = vmatprep.subr.bf16.mxu1 %v978_v13 }
  0x3f   : > { %894 = vmatprep.subr.bf16.mxu0 %v963_v6 }
  0x41   : > { %925 = vmatpush3.bf16.msra.mxu1 %v978_v13 }
  0x42   : > { %895 = vmatpush3.bf16.msra.mxu0 %v963_v6  ;;  %926 = vmatprep.subr.bf16.mxu1 %v979_v16 }
  0x43   : > { %896 = vmatprep.subr.bf16.mxu0 %v964_v9 }
  0x45   : > { %927 = vmatpush3.bf16.msra.mxu1 %v979_v16 }
  0x46   : > { %897 = vmatpush3.bf16.msra.mxu0 %v964_v9  ;;  %928 = vmatprep.subr.bf16.mxu1 %v980_v22 }
  0x47   : > { %898 = vmatprep.subr.bf16.mxu0 %v965_v11 }
  0x49   : > { %929 = vmatpush3.bf16.msra.mxu1 %v980_v22 }
  0x4a   : > { %899 = vmatpush3.bf16.msra.mxu0 %v965_v11  ;;  %930 = vmatprep.subr.bf16.mxu1 %v981_v23 }
  0x4d   : > { %901 = vmatmul.mubr.bf16.vlgmr.msra.gmra.mrb[0].mxu0 %v967_v14  ;;  %931 = vmatpush3.bf16.msra.mxu1 %v981_v23 }
  0x4e   : > { %904 = vmatprep.mubr.bf16.mxu0 %v968_v15 }
  0x55   : > { %905 = vmatmul.mubr.bf16.gmra.mrb[4].mxu0 %v969_v17  ;;  %v840_v17 = vld [vmem:[%s1165_s6] ss:$0 sm:$0xff] }
  0x56   : > { %908 = vmatprep.mubr.bf16.mxu0 %v970_v18 }
  0x5d   : > { %909 = vmatmul.mubr.bf16.gmra.mrb[8].mxu0 %v971_v19 }
  0x5e   : > { %912 = vmatprep.mubr.bf16.mxu0 %v972_v20 }
  0x65   : > { %913 = vmatmul.mubr.bf16.gmra.mrb[12].mxu0 %v973_v21 }
 0x120   : > { %v902_v25 = vpop.f32.mrb[0].mxu0 }
 0x121   : > { %v472_v26 = vadd.f32 %v902_v25, %v823_v24  ;;  %v463_v27 = vpop.f32.mrb[1].mxu0 }
 0x122   : > { %v464_v28 = vadd.f32 %v823_v24, %v463_v27  ;;  %v903_v29 = vpop.f32.mrb[2].mxu0 }
 0x123   : > { %v475_v30 = vadd.f32 %v903_v29, %v823_v24  ;;  %v466_v31 = vpop.f32.mrb[3].mxu0  ;;  %v528_v33 = vmax.f32 %v472_v26, 0.0 }
 0x124   : > { %v467_v32 = vadd.f32 %v823_v24, %v466_v31  ;;  %v526_v35 = vmax.f32 %v464_v28, 0.0 }
 0x125   : > { %v529_v34 = vmax.f32 %v475_v30, 0.0 }
 0x126   : > { %v527_v36 = vmax.f32 %v467_v32, 0.0 }
 0x127   : > { %v543_v37 = vpack.c.bf16 %v529_v34, %v528_v33 }
 0x128   : > { %v906_v38 = vpop.f32.mrb[4].mxu0  ;;  %v542_v39 = vpack.c.bf16 %v527_v36, %v526_v35 }
 0x129   : > { %v488_v40 = vadd.f32 %v906_v38, %v823_v24  ;;  %v479_v41 = vpop.f32.mrb[5].mxu0 }
 0x12a   : > { %v480_v42 = vadd.f32 %v823_v24, %v479_v41  ;;  %v907_v43 = vpop.f32.mrb[6].mxu0  ;;  %932 = vmatprep.mubr.bf16.mxu1 %v542_v39 }
 0x12b   : > { %v491_v44 = vadd.f32 %v907_v43, %v823_v24  ;;  %v482_v45 = vpop.f32.mrb[7].mxu0  ;;  %933 = vmatmul.mubr.bf16.vlgmr.msra.gmra.mrb[0].mxu1 %v543_v37  ;;  %v532_v47 = vmax.f32 %v488_v40, 0.0 }
 0x12c   : > { %v483_v46 = vadd.f32 %v823_v24, %v482_v45  ;;  %v530_v49 = vmax.f32 %v480_v42, 0.0 }
 0x12d   : > { %v533_v48 = vmax.f32 %v491_v44, 0.0 }
 0x12e   : > { %v531_v50 = vmax.f32 %v483_v46, 0.0 }
 0x12f   : > { %v545_v51 = vpack.c.bf16 %v533_v48, %v532_v47 }
 0x130   : > { %v544_v52 = vpack.c.bf16 %v531_v50, %v530_v49  ;;  %v910_v53 = vpop.f32.mrb[8].mxu0 }
 0x131   : > { %v504_v54 = vadd.f32 %v910_v53, %v823_v24  ;;  %v495_v55 = vpop.f32.mrb[9].mxu0 }
 0x132   : > { %v496_v56 = vadd.f32 %v823_v24, %v495_v55  ;;  %v911_v57 = vpop.f32.mrb[10].mxu0  ;;  %936 = vmatprep.mubr.bf16.mxu1 %v544_v52 }
 0x133   : > { %v507_v58 = vadd.f32 %v911_v57, %v823_v24  ;;  %v498_v59 = vpop.f32.mrb[11].mxu0  ;;  %937 = vmatmul.mubr.bf16.gmra.mrb[4].mxu1 %v545_v51  ;;  %v536_v61 = vmax.f32 %v504_v54, 0.0 }
 0x134   : > { %v499_v60 = vadd.f32 %v823_v24, %v498_v59  ;;  %v534_v63 = vmax.f32 %v496_v56, 0.0 }
 0x135   : > { %v537_v62 = vmax.f32 %v507_v58, 0.0 }
 0x136   : > { %v535_v0 = vmax.f32 %v499_v60, 0.0 }
 0x137   : > { %v547_v1 = vpack.c.bf16 %v537_v62, %v536_v61 }
 0x138   : > { %v546_v2 = vpack.c.bf16 %v535_v0, %v534_v63  ;;  %v914_v3 = vpop.f32.mrb[12].mxu0 }
 0x139   : > { %v520_v4 = vadd.f32 %v914_v3, %v823_v24  ;;  %v511_v5 = vpop.f32.mrb[13].mxu0 }
 0x13a   : > { %v512_v6 = vadd.f32 %v823_v24, %v511_v5  ;;  %v915_v7 = vpop.f32.mrb[14].mxu0  ;;  %940 = vmatprep.mubr.bf16.mxu1 %v546_v2 }
 0x13b   : > { %v523_v8 = vadd.f32 %v915_v7, %v823_v24  ;;  %v514_v9 = vpop.f32.mrb[15].mxu0  ;;  %941 = vmatmul.mubr.bf16.gmra.mrb[8].mxu1 %v547_v1  ;;  %v540_v11 = vmax.f32 %v520_v4, 0.0 }
 0x13c   : > { %v515_v10 = vadd.f32 %v823_v24, %v514_v9  ;;  %v538_v13 = vmax.f32 %v512_v6, 0.0 }
 0x13d   : > { %v541_v12 = vmax.f32 %v523_v8, 0.0 }
 0x13e   : > { %v539_v14 = vmax.f32 %v515_v10, 0.0 }
 0x13f   : > { %v549_v15 = vpack.c.bf16 %v541_v12, %v540_v11 }
 0x140   : > { %v548_v16 = vpack.c.bf16 %v539_v14, %v538_v13 }
 0x142   : > { %944 = vmatprep.mubr.bf16.mxu1 %v548_v16 }
 0x143   : > { %945 = vmatmul.mubr.bf16.gmra.mrb[12].mxu1 %v549_v15 }
 0x1fe   : > { %v934_v18 = vpop.f32.mrb[0].mxu1 }
 0x1ff   : > { %v664_v19 = vadd.f32 %v934_v18, %v840_v17  ;;  %v655_v20 = vpop.f32.mrb[1].mxu1 }
 0x200   : > { %v656_v21 = vadd.f32 %v840_v17, %v655_v20  ;;  %v935_v22 = vpop.f32.mrb[2].mxu1 }
 0x201   : > { %720 = vst [vmem:[%s1080_s22 + $0x10] sm:$0xff] %v664_v19  ;;  %v667_v23 = vadd.f32 %v935_v22, %v840_v17  ;;  %v658_v24 = vpop.f32.mrb[3].mxu1 }
 0x202   : > { %718 = vst [vmem:[%s1080_s22] sm:$0xff] %v656_v21  ;;  %v659_v25 = vadd.f32 %v840_v17, %v658_v24 }
 0x203   : > { %721 = vst [vmem:[%s1080_s22 + $0x18] sm:$0xff] %v667_v23 }
 0x204   : > { %719 = vst [vmem:[%s1080_s22 + $0x8] sm:$0xff] %v659_v25 }
 0x206   : > { %v938_v26 = vpop.f32.mrb[4].mxu1 }
 0x207   : > { %v680_v27 = vadd.f32 %v938_v26, %v840_v17  ;;  %v671_v28 = vpop.f32.mrb[5].mxu1 }
 0x208   : > { %v672_v29 = vadd.f32 %v840_v17, %v671_v28  ;;  %v939_v30 = vpop.f32.mrb[6].mxu1 }
 0x209   : > { %724 = vst [vmem:[%s1080_s22 + $0x30] sm:$0xff] %v680_v27  ;;  %v683_v31 = vadd.f32 %v939_v30, %v840_v17  ;;  %v674_v32 = vpop.f32.mrb[7].mxu1 }
 0x20a   : > { %722 = vst [vmem:[%s1080_s22 + $0x20] sm:$0xff] %v672_v29  ;;  %v675_v33 = vadd.f32 %v840_v17, %v674_v32 }
 0x20b   : > { %725 = vst [vmem:[%s1080_s22 + $0x38] sm:$0xff] %v683_v31 }
 0x20c   : > { %723 = vst [vmem:[%s1080_s22 + $0x28] sm:$0xff] %v675_v33 }
 0x20e   : > { %v942_v34 = vpop.f32.mrb[8].mxu1 }
 0x20f   : > { %v696_v35 = vadd.f32 %v942_v34, %v840_v17  ;;  %v687_v36 = vpop.f32.mrb[9].mxu1 }
 0x210   : > { %v688_v37 = vadd.f32 %v840_v17, %v687_v36  ;;  %v943_v38 = vpop.f32.mrb[10].mxu1 }
 0x211   : > { %728 = vst [vmem:[%s1080_s22 + $0x50] sm:$0xff] %v696_v35  ;;  %v699_v39 = vadd.f32 %v943_v38, %v840_v17  ;;  %v690_v40 = vpop.f32.mrb[11].mxu1 }
 0x212   : > { %726 = vst [vmem:[%s1080_s22 + $0x40] sm:$0xff] %v688_v37  ;;  %v691_v41 = vadd.f32 %v840_v17, %v690_v40 }
 0x213   : > { %729 = vst [vmem:[%s1080_s22 + $0x58] sm:$0xff] %v699_v39 }
 0x214   : > { %727 = vst [vmem:[%s1080_s22 + $0x48] sm:$0xff] %v691_v41 }
 0x216   : > { %v946_v42 = vpop.f32.mrb[12].mxu1 }
 0x217   : > { %v712_v43 = vadd.f32 %v946_v42, %v840_v17  ;;  %v703_v44 = vpop.f32.mrb[13].mxu1 }
 0x218   : > { %v704_v45 = vadd.f32 %v840_v17, %v703_v44  ;;  %v947_v46 = vpop.f32.mrb[14].mxu1 }
 0x219   : > { %732 = vst [vmem:[%s1080_s22 + $0x70] sm:$0xff] %v712_v43  ;;  %v715_v47 = vadd.f32 %v947_v46, %v840_v17  ;;  %v706_v48 = vpop.f32.mrb[15].mxu1 }
 0x21a   : > { %730 = vst [vmem:[%s1080_s22 + $0x60] sm:$0xff] %v704_v45  ;;  %v707_v49 = vadd.f32 %v840_v17, %v706_v48 }
 0x21b   : > { %733 = vst [vmem:[%s1080_s22 + $0x78] sm:$0xff] %v715_v47 }
 0x21c   : > { %731 = vst [vmem:[%s1080_s22 + $0x68] sm:$0xff] %v707_v49 }
 0x21d PF: > { %s27_s1 = sadd.s32 1, %s1014_s1  }
 0x21e   : > { %p24_p3 = scmp.ge.s32.totalorder %s27_s1, 6  }
 0x220   :  { %26 = sbr.rel (!%p24_p3) target bundleno = 26 (0x1a), region = 80 }

// kernel: custom-call.6
= control target key start
LH: loop header
LB: loop body
LE: loop exit
PB: predicated region body
PF: predicated region fallthrough
CT: control target
= control target key end

     0   :  { %s6_s0 = inlined_call_operand.vmem [shape: f32[24,16], index: 0, kind: output, shape index: {}]  }

// kernel: linear_probe_per_scene.1
= control target key start
LH: loop header
LB: loop body
LE: loop exit
PB: predicated region body
PF: predicated region fallthrough
CT: control target
= control target key end

     0   :  { %s1160_s0 = inlined_call_operand.vmem [shape: s32[4], index: 0, kind: input, shape index: {}]   ;;  %s1161_s2 = inlined_call_operand.vmem [shape: bf16[512,128], index: 2, kind: input, shape index: {}]   ;;  %s1162_s3 = inlined_call_operand.vmem [shape: bf16[4,128,128], index: 3, kind: input, shape index: {}]   ;;  %s1163_s4 = inlined_call_operand.vmem [shape: f32[4,1,128], index: 4, kind: input, shape index: {}]   ;;  %s1164_s5 = inlined_call_operand.vmem [shape: bf16[128,128], index: 5, kind: input, shape index: {}]   ;;  %s1165_s6 = inlined_call_operand.vmem [shape: f32[1,128], index: 6, kind: input, shape index: {}]   ;;  %s1166_s7 = inlined_call_operand.vmem [shape: f32[512,128], index: 7, kind: output, shape index: {}]   ;;  %s1167_s1 = inlined_call_operand.vmem [shape: s32[4], index: 1, kind: input, shape index: {}]  }
   0x1   :  { %s12_s26 = sshll.u32 %s1160_s0, 4  ;;  %s16_s29 = sshll.u32 %s1167_s1, 4  ;;  %s13_s26 = int_to_ptr.vmem [resolvable:$true] %s12_s26  ;;  %s17_s29 = int_to_ptr.vmem [resolvable:$true] %s16_s29 }
   0x2   :  { %s982_s30 = scalar_lea.vmem %s13_s26, 16  ;;  %p987_p1 = scmp.lt.s32.totalorder %s13_s26, %s13_s26 }
   0x3   :  { %p983_p0 = scmp.ne.s32.totalorder %s13_s26, %s982_s30  ;;  %p988_p2 = scmp.lt.s32.totalorder %s982_s30, %s982_s30 }
   0x5   :  { %p989_p3 = por %p988_p2, %p987_p1 }
   0x7   :  { %p990_p4 = pnand %p989_p3, %p983_p0 }
   0x9   :  { %993 = shalt.err (!%p990_p4)  }
   0xa   :  { %s1016_s8 = smov [#allocation3]   ;;  %s994_s9 = scalar_lea.vmem %s17_s29, 16 }
   0xb   :  { %15 = dma.vmem_to_smem %s13_s26, 16, %s1016_s8, [#allocation2] }
   0xc   :  { %p995_p5 = scmp.ne.s32.totalorder %s17_s29, %s994_s9  ;;  %p999_p6 = scmp.lt.s32.totalorder %s17_s29, %s17_s29 }
   0xd   :  { %p1000_p7 = scmp.lt.s32.totalorder %s994_s9, %s994_s9 }
   0xf   :  { %p1001_p8 = por %p1000_p7, %p999_p6 }
  0x11   :  { %p1002_p9 = pnand %p1001_p8, %p995_p5 }
  0x13   :  { %1005 = shalt.err (!%p1002_p9)  }
  0x14   :  { %s1017_s0 = smov [#allocation4]  }
  0x15   :  { %19 = dma.vmem_to_smem %s17_s29, 16, %s1017_s0, [#allocation2] }
  0x16   :  { %1010 = dma.done.wait [#allocation2], 32 }
  0x17   :  { %1011 = vsyncadd [#allocation2], 4294967264 }
  0x18   :  { %21 = sfence }
  0x19   :  { %s1064_s1 = smov 0  }
  0x1a LB: > { %s811_s10 = sadd.s32 4294967295, %s1014_s1   ;;  %p815_p10 = scmp.ge.s32.totalorder %s1014_s1, 1  ;;  %s1014_s1 = sphi %s1064_s1, %s27_s1  }
  0x1b   : > { %p226_p11 = scmp.lt.s32.totalorder %s1014_s1, 5 }
  0x1d   : > { %p227_p12 = pnand %p815_p10, %p226_p11 }
  0x1e   : > { %s816_s11 = sshll.u32 (!%p227_p12), %s811_s10, 4  ;;  %s270_s12 = sld [smem:[#allocation3 + %s811_s10]] (!%p227_p12) }
  0x1f   : > { %230 = sbr.rel (%p227_p12) target bundleno = 541 (0x21d), region = 40  ;;  %p265_p13 = scmp.lt.s32.totalorder (!%p227_p12), %s816_s11, 63 }
  0x20   : > { %s277_s13 = sld [smem:[#allocation3 + %s811_s10]] (!%p227_p12) }
  0x21   : > { %s289_s14 = sld [smem:[#allocation4 + %s811_s10]] (!%p227_p12) }
  0x24   : > { %p271_p0 = scmp.lt.s32.totalorder (!%p227_p12), %s270_s12, 3 }
  0x26   : > { %s1169_s11 = smov (!%p265_p13, %s816_s11), 63  ;;  %p278_p1 = scmp.lt.s32.totalorder %s277_s13, 3 }
  0x27   : > { %s817_s15 = sshll.u32 %s1169_s11, 2  ;;  %s821_s16 = sshll.u32 %s1169_s11, 3 }
  0x28   : > { %s1075_s19 = scalar_lea.vmem %s1161_s2, %s817_s15  ;;  %s1080_s22 = scalar_lea.vmem %s1166_s7, %s821_s16 }
  0x29   : > { %s1171_s12 = smov (!%p271_p0, %s270_s12), 3  ;;  %s1173_s13 = smov (!%p278_p1, %s277_s13), 3 }
  0x2a   : > { %s851_s23 = sshll.u32 %s1171_s12, 6  ;;  %s280_s29 = scalar_lea.vmem %s1163_s4, %s1173_s13 }
  0x2b   : > { %s1087_s26 = scalar_lea.vmem %s1162_s3, %s851_s23  ;;  %p822_p2 = scmp.eq.s32.totalorder %s289_s14, 0 }
  0x2c   : > { %v958_v0 = vld [vmem:[%s1087_s26] sm:$0xff] (!%p822_p2)   ;;  %v959_v1 = vld [vmem:[%s1087_s26 + $0x8] sm:$0xff] (!%p822_p2)   ;;  %v960_v2 = vld [vmem:[%s1087_s26 + $0x10] sm:$0xff] (!%p822_p2)  }
  0x2d   : > { %293 = sbr.rel (%p822_p2) target bundleno = 541 (0x21d), region = 44  ;;  %884 = vmatprep.subr.bf16.mxu0 (!%p822_p2), %v958_v0  ;;  %v961_v3 = vld [vmem:[%s1087_s26 + $0x18] sm:$0xff] (!%p822_p2)   ;;  %v966_v4 = vld [vmem:[%s1075_s19] sm:$0xff] (!%p822_p2)   ;;  %v963_v6 = vld [vmem:[%s1087_s26 + $0x28] sm:$0xff] (!%p822_p2)  }
  0x2e   : > { %885 = vmatpush3.bf16.msra.mxu0 (!%p822_p2), %v958_v0  ;;  %900 = vmatprep.mubr.bf16.mxu0 (!%p822_p2), %v966_v4  ;;  %v962_v5 = vld [vmem:[%s1087_s26 + $0x20] sm:$0xff] (!%p822_p2)   ;;  %v975_v8 = vld [vmem:[%s1164_s5 + $0x8] sm:$0xff] (!%p822_p2)   ;;  %v964_v9 = vld [vmem:[%s1087_s26 + $0x30] sm:$0xff] (!%p822_p2)  }
  0x2f   : > { %886 = vmatprep.subr.bf16.mxu0 (!%p822_p2), %v959_v1  ;;  %v974_v7 = vld [vmem:[%s1164_s5] sm:$0xff] (!%p822_p2)   ;;  %v976_v10 = vld [vmem:[%s1164_s5 + $0x10] sm:$0xff] (!%p822_p2)   ;;  %v965_v11 = vld [vmem:[%s1087_s26 + $0x38] sm:$0xff] (!%p822_p2)  }
  0x30   : > { %916 = vmatprep.subr.bf16.mxu1 (!%p822_p2), %v974_v7  ;;  %v977_v12 = vld [vmem:[%s1164_s5 + $0x18] sm:$0xff] (!%p822_p2)   ;;  %v978_v13 = vld [vmem:[%s1164_s5 + $0x20] sm:$0xff] (!%p822_p2)   ;;  %v967_v14 = vld [vmem:[%s1075_s19 + $0x8] sm:$0xff] (!%p822_p2)  }
  0x31   : > { %917 = vmatpush3.bf16.msra.mxu1 (!%p822_p2), %v974_v7  ;;  %v968_v15 = vld [vmem:[%s1075_s19 + $0x10] sm:$0xff] (!%p822_p2)   ;;  %v979_v16 = vld [vmem:[%s1164_s5 + $0x28] sm:$0xff] (!%p822_p2)   ;;  %v969_v17 = vld [vmem:[%s1075_s19 + $0x18] sm:$0xff] (!%p822_p2)  }
  0x32   : > { %887 = vmatpush3.bf16.msra.mxu0 (!%p822_p2), %v959_v1  ;;  %918 = vmatprep.subr.bf16.mxu1 (!%p822_p2), %v975_v8  ;;  %v970_v18 = vld [vmem:[%s1075_s19 + $0x20] sm:$0xff] (!%p822_p2)   ;;  %v971_v19 = vld [vmem:[%s1075_s19 + $0x28] sm:$0xff] (!%p822_p2)   ;;  %v972_v20 = vld [vmem:[%s1075_s19 + $0x30] sm:$0xff] (!%p822_p2)  }
  0x33   : > { %888 = vmatprep.subr.bf16.mxu0 (!%p822_p2), %v960_v2  ;;  %v973_v21 = vld [vmem:[%s1075_s19 + $0x38] sm:$0xff] (!%p822_p2)   ;;  %v980_v22 = vld [vmem:[%s1164_s5 + $0x30] sm:$0xff] (!%p822_p2)   ;;  %v823_v24 = vld [vmem:[%s280_s29] ss:$0 sm:$0xff] (!%p822_p2) }
  0x34   : > { %v981_v23 = vld [vmem:[%s1164_s5 + $0x38] sm:$0xff]  }
  0x35   : > { %919 = vmatpush3.bf16.msra.mxu1 %v975_v8 }
  0x36   : > { %889 = vmatpush3.bf16.msra.mxu0 %v960_v2  ;;  %920 = vmatprep.subr.bf16.mxu1 %v976_v10 }
  0x37   : > { %890 = vmatprep.subr.bf16.mxu0 %v961_v3 }
  0x39   : > { %921 = vmatpush3.bf16.msra.mxu1 %v976_v10 }
  0x3a   : > { %891 = vmatpush3.bf16.msra.mxu0 %v961_v3  ;;  %922 = vmatprep.subr.bf16.mxu1 %v977_v12 }
  0x3b   : > { %892 = vmatprep.subr.bf16.mxu0 %v962_v5 }
  0x3d   : > { %923 = vmatpush3.bf16.msra.mxu1 %v977_v12 }
  0x3e   : > { %893 = vmatpush3.bf16.msra.mxu0 %v962_v5  ;;  %924 = vmatprep.subr.bf16.mxu1 %v978_v13 }
  0x3f   : > { %894 = vmatprep.subr.bf16.mxu0 %v963_v6 }
  0x41   : > { %925 = vmatpush3.bf16.msra.mxu1 %v978_v13 }
  0x42   : > { %895 = vmatpush3.bf16.msra.mxu0 %v963_v6  ;;  %926 = vmatprep.subr.bf16.mxu1 %v979_v16 }
  0x43   : > { %896 = vmatprep.subr.bf16.mxu0 %v964_v9 }
  0x45   : > { %927 = vmatpush3.bf16.msra.mxu1 %v979_v16 }
  0x46   : > { %897 = vmatpush3.bf16.msra.mxu0 %v964_v9  ;;  %928 = vmatprep.subr.bf16.mxu1 %v980_v22 }
  0x47   : > { %898 = vmatprep.subr.bf16.mxu0 %v965_v11 }
  0x49   : > { %929 = vmatpush3.bf16.msra.mxu1 %v980_v22 }
  0x4a   : > { %899 = vmatpush3.bf16.msra.mxu0 %v965_v11  ;;  %930 = vmatprep.subr.bf16.mxu1 %v981_v23 }
  0x4d   : > { %901 = vmatmul.mubr.bf16.vlgmr.msra.gmra.mrb[0].mxu0 %v967_v14  ;;  %931 = vmatpush3.bf16.msra.mxu1 %v981_v23 }
  0x4e   : > { %904 = vmatprep.mubr.bf16.mxu0 %v968_v15 }
  0x55   : > { %905 = vmatmul.mubr.bf16.gmra.mrb[4].mxu0 %v969_v17  ;;  %v840_v17 = vld [vmem:[%s1165_s6] ss:$0 sm:$0xff] }
  0x56   : > { %908 = vmatprep.mubr.bf16.mxu0 %v970_v18 }
  0x5d   : > { %909 = vmatmul.mubr.bf16.gmra.mrb[8].mxu0 %v971_v19 }
  0x5e   : > { %912 = vmatprep.mubr.bf16.mxu0 %v972_v20 }
  0x65   : > { %913 = vmatmul.mubr.bf16.gmra.mrb[12].mxu0 %v973_v21 }
 0x120   : > { %v902_v25 = vpop.f32.mrb[0].mxu0 }
 0x121   : > { %v472_v26 = vadd.f32 %v902_v25, %v823_v24  ;;  %v463_v27 = vpop.f32.mrb[1].mxu0 }
 0x122   : > { %v464_v28 = vadd.f32 %v823_v24, %v463_v27  ;;  %v903_v29 = vpop.f32.mrb[2].mxu0 }
 0x123   : > { %v475_v30 = vadd.f32 %v903_v29, %v823_v24  ;;  %v466_v31 = vpop.f32.mrb[3].mxu0  ;;  %v528_v33 = vmax.f32 %v472_v26, 0.0 }
 0x124   : > { %v467_v32 = vadd.f32 %v823_v24, %v466_v31  ;;  %v526_v35 = vmax.f32 %v464_v28, 0.0 }
 0x125   : > { %v529_v34 = vmax.f32 %v475_v30, 0.0 }
 0x126   : > { %v527_v36 = vmax.f32 %v467_v32, 0.0 }
 0x127   : > { %v543_v37 = vpack.c.bf16 %v529_v34, %v528_v33 }
 0x128   : > { %v906_v38 = vpop.f32.mrb[4].mxu0  ;;  %v542_v39 = vpack.c.bf16 %v527_v36, %v526_v35 }
 0x129   : > { %v488_v40 = vadd.f32 %v906_v38, %v823_v24  ;;  %v479_v41 = vpop.f32.mrb[5].mxu0 }
 0x12a   : > { %v480_v42 = vadd.f32 %v823_v24, %v479_v41  ;;  %v907_v43 = vpop.f32.mrb[6].mxu0  ;;  %932 = vmatprep.mubr.bf16.mxu1 %v542_v39 }
 0x12b   : > { %v491_v44 = vadd.f32 %v907_v43, %v823_v24  ;;  %v482_v45 = vpop.f32.mrb[7].mxu0  ;;  %933 = vmatmul.mubr.bf16.vlgmr.msra.gmra.mrb[0].mxu1 %v543_v37  ;;  %v532_v47 = vmax.f32 %v488_v40, 0.0 }
 0x12c   : > { %v483_v46 = vadd.f32 %v823_v24, %v482_v45  ;;  %v530_v49 = vmax.f32 %v480_v42, 0.0 }
 0x12d   : > { %v533_v48 = vmax.f32 %v491_v44, 0.0 }
 0x12e   : > { %v531_v50 = vmax.f32 %v483_v46, 0.0 }
 0x12f   : > { %v545_v51 = vpack.c.bf16 %v533_v48, %v532_v47 }
 0x130   : > { %v544_v52 = vpack.c.bf16 %v531_v50, %v530_v49  ;;  %v910_v53 = vpop.f32.mrb[8].mxu0 }
 0x131   : > { %v504_v54 = vadd.f32 %v910_v53, %v823_v24  ;;  %v495_v55 = vpop.f32.mrb[9].mxu0 }
 0x132   : > { %v496_v56 = vadd.f32 %v823_v24, %v495_v55  ;;  %v911_v57 = vpop.f32.mrb[10].mxu0  ;;  %936 = vmatprep.mubr.bf16.mxu1 %v544_v52 }
 0x133   : > { %v507_v58 = vadd.f32 %v911_v57, %v823_v24  ;;  %v498_v59 = vpop.f32.mrb[11].mxu0  ;;  %937 = vmatmul.mubr.bf16.gmra.mrb[4].mxu1 %v545_v51  ;;  %v536_v61 = vmax.f32 %v504_v54, 0.0 }
 0x134   : > { %v499_v60 = vadd.f32 %v823_v24, %v498_v59  ;;  %v534_v63 = vmax.f32 %v496_v56, 0.0 }
 0x135   : > { %v537_v62 = vmax.f32 %v507_v58, 0.0 }
 0x136   : > { %v535_v0 = vmax.f32 %v499_v60, 0.0 }
 0x137   : > { %v547_v1 = vpack.c.bf16 %v537_v62, %v536_v61 }
 0x138   : > { %v546_v2 = vpack.c.bf16 %v535_v0, %v534_v63  ;;  %v914_v3 = vpop.f32.mrb[12].mxu0 }
 0x139   : > { %v520_v4 = vadd.f32 %v914_v3, %v823_v24  ;;  %v511_v5 = vpop.f32.mrb[13].mxu0 }
 0x13a   : > { %v512_v6 = vadd.f32 %v823_v24, %v511_v5  ;;  %v915_v7 = vpop.f32.mrb[14].mxu0  ;;  %940 = vmatprep.mubr.bf16.mxu1 %v546_v2 }
 0x13b   : > { %v523_v8 = vadd.f32 %v915_v7, %v823_v24  ;;  %v514_v9 = vpop.f32.mrb[15].mxu0  ;;  %941 = vmatmul.mubr.bf16.gmra.mrb[8].mxu1 %v547_v1  ;;  %v540_v11 = vmax.f32 %v520_v4, 0.0 }
 0x13c   : > { %v515_v10 = vadd.f32 %v823_v24, %v514_v9  ;;  %v538_v13 = vmax.f32 %v512_v6, 0.0 }
 0x13d   : > { %v541_v12 = vmax.f32 %v523_v8, 0.0 }
 0x13e   : > { %v539_v14 = vmax.f32 %v515_v10, 0.0 }
 0x13f   : > { %v549_v15 = vpack.c.bf16 %v541_v12, %v540_v11 }
 0x140   : > { %v548_v16 = vpack.c.bf16 %v539_v14, %v538_v13 }
 0x142   : > { %944 = vmatprep.mubr.bf16.mxu1 %v548_v16 }
 0x143   : > { %945 = vmatmul.mubr.bf16.gmra.mrb[12].mxu1 %v549_v15 }
 0x1fe   : > { %v934_v18 = vpop.f32.mrb[0].mxu1 }
 0x1ff   : > { %v664_v19 = vadd.f32 %v934_v18, %v840_v17  ;;  %v655_v20 = vpop.f32.mrb[1].mxu1 }
 0x200   : > { %v656_v21 = vadd.f32 %v840_v17, %v655_v20  ;;  %v935_v22 = vpop.f32.mrb[2].mxu1 }
 0x201   : > { %720 = vst [vmem:[%s1080_s22 + $0x10] sm:$0xff] %v664_v19  ;;  %v667_v23 = vadd.f32 %v935_v22, %v840_v17  ;;  %v658_v24 = vpop.f32.mrb[3].mxu1 }
 0x202   : > { %718 = vst [vmem:[%s1080_s22] sm:$0xff] %v656_v21  ;;  %v659_v25 = vadd.f32 %v840_v17, %v658_v24 }
 0x203   : > { %721 = vst [vmem:[%s1080_s22 + $0x18] sm:$0xff] %v667_v23 }
 0x204   : > { %719 = vst [vmem:[%s1080_s22 + $0x8] sm:$0xff] %v659_v25 }
 0x206   : > { %v938_v26 = vpop.f32.mrb[4].mxu1 }
 0x207   : > { %v680_v27 = vadd.f32 %v938_v26, %v840_v17  ;;  %v671_v28 = vpop.f32.mrb[5].mxu1 }
 0x208   : > { %v672_v29 = vadd.f32 %v840_v17, %v671_v28  ;;  %v939_v30 = vpop.f32.mrb[6].mxu1 }
 0x209   : > { %724 = vst [vmem:[%s1080_s22 + $0x30] sm:$0xff] %v680_v27  ;;  %v683_v31 = vadd.f32 %v939_v30, %v840_v17  ;;  %v674_v32 = vpop.f32.mrb[7].mxu1 }
 0x20a   : > { %722 = vst [vmem:[%s1080_s22 + $0x20] sm:$0xff] %v672_v29  ;;  %v675_v33 = vadd.f32 %v840_v17, %v674_v32 }
 0x20b   : > { %725 = vst [vmem:[%s1080_s22 + $0x38] sm:$0xff] %v683_v31 }
 0x20c   : > { %723 = vst [vmem:[%s1080_s22 + $0x28] sm:$0xff] %v675_v33 }
 0x20e   : > { %v942_v34 = vpop.f32.mrb[8].mxu1 }
 0x20f   : > { %v696_v35 = vadd.f32 %v942_v34, %v840_v17  ;;  %v687_v36 = vpop.f32.mrb[9].mxu1 }
 0x210   : > { %v688_v37 = vadd.f32 %v840_v17, %v687_v36  ;;  %v943_v38 = vpop.f32.mrb[10].mxu1 }
 0x211   : > { %728 = vst [vmem:[%s1080_s22 + $0x50] sm:$0xff] %v696_v35  ;;  %v699_v39 = vadd.f32 %v943_v38, %v840_v17  ;;  %v690_v40 = vpop.f32.mrb[11].mxu1 }
 0x212   : > { %726 = vst [vmem:[%s1080_s22 + $0x40] sm:$0xff] %v688_v37  ;;  %v691_v41 = vadd.f32 %v840_v17, %v690_v40 }
 0x213   : > { %729 = vst [vmem:[%s1080_s22 + $0x58] sm:$0xff] %v699_v39 }
 0x214   : > { %727 = vst [vmem:[%s1080_s22 + $0x48] sm:$0xff] %v691_v41 }
 0x216   : > { %v946_v42 = vpop.f32.mrb[12].mxu1 }
 0x217   : > { %v712_v43 = vadd.f32 %v946_v42, %v840_v17  ;;  %v703_v44 = vpop.f32.mrb[13].mxu1 }
 0x218   : > { %v704_v45 = vadd.f32 %v840_v17, %v703_v44  ;;  %v947_v46 = vpop.f32.mrb[14].mxu1 }
 0x219   : > { %732 = vst [vmem:[%s1080_s22 + $0x70] sm:$0xff] %v712_v43  ;;  %v715_v47 = vadd.f32 %v947_v46, %v840_v17  ;;  %v706_v48 = vpop.f32.mrb[15].mxu1 }
 0x21a   : > { %730 = vst [vmem:[%s1080_s22 + $0x60] sm:$0xff] %v704_v45  ;;  %v707_v49 = vadd.f32 %v840_v17, %v706_v48 }
 0x21b   : > { %733 = vst [vmem:[%s1080_s22 + $0x78] sm:$0xff] %v715_v47 }
 0x21c   : > { %731 = vst [vmem:[%s1080_s22 + $0x68] sm:$0xff] %v707_v49 }
 0x21d PF: > { %s27_s1 = sadd.s32 1, %s1014_s1  }
 0x21e   : > { %p24_p3 = scmp.ge.s32.totalorder %s27_s1, 6  }
 0x220   :  { %26 = sbr.rel (!%p24_p3) target bundleno = 26 (0x1a), region = 80 }

</bundles_post_ra>
